<compile_context>
chip_gen: v5e
topology: v5e:2x2
jax: 0.10.0
libtpu: 0.0.40
codegen_flags: <defaults>
</compile_context>

<pallas_src>
import functools

import jax
import jax.numpy as jnp
from jax import lax
from jax.experimental import pallas as pl
from jax.experimental.pallas import tpu as pltpu


def _dice_kernel(x_ref, t_ref, num_ref, den_ref, *, n_inner, tile_w, lane_acc,
                 width, full_tiles, grid_tiles, rows):
    o = pl.program_id(0)          # "parallel" outer D-chunk axis
    i = pl.program_id(1)          # "arbitrary" inner reduction axis
    flat = o * n_inner + i        # logical tile index along D

    @pl.when(i == 0)
    def _():
        num_ref[...] = jnp.zeros_like(num_ref)
        den_ref[...] = jnp.zeros_like(den_ref)

    n_chunks = tile_w // lane_acc

    def accumulate(masked):
        num_p = num_ref[0]
        den_p = den_ref[0]
        # Hot loop: pure vld + vmul + vadd on lane-dense (rows, lane_acc)
        # slices; the cross-lane reduce is deferred to plain JAX outside.
        for k in range(n_chunks):
            xs = x_ref[:, k * lane_acc:(k + 1) * lane_acc].astype(jnp.float32)
            ts = t_ref[:, k * lane_acc:(k + 1) * lane_acc].astype(jnp.float32)
            if masked:
                col = (flat * tile_w + k * lane_acc
                       + lax.broadcasted_iota(jnp.int32, (rows, lane_acc), 1))
                valid = col < width
                xs = jnp.where(valid, xs, 0.0)
                ts = jnp.where(valid, ts, 0.0)
            num_p = num_p + xs * ts          # numerator: sum(x * t)
            den_p = den_p + (xs + ts)        # fused denominator: sum(x) + sum(t)
        num_ref[0] = num_p
        den_ref[0] = den_p

    if full_tiles == grid_tiles:
        # Every grid step is fully in bounds: no masking anywhere.
        accumulate(False)
    elif full_tiles == 0:
        accumulate(True)
    else:
        @pl.when(flat < full_tiles)
        def _():
            accumulate(False)

        @pl.when(flat >= full_tiles)
        def _():
            accumulate(True)


def dice_loss(inputs, targets, smooth=1.0, *, block_bytes=2 * 1024 * 1024):
    """Pallas implementation of DiceLoss.forward. Returns a float32 scalar."""
    n = targets.shape[0]
    x = inputs.reshape(n, -1)
    t = targets.reshape(n, -1)
    d = x.shape[1]

    # Spread each sample over several sublane rows when the batch is small so
    # vregs are better utilized (free: contiguous row-major reshape).
    r = 1
    if n < 8:
        for cand in (8, 4, 2):
            if d % cand == 0:
                r = cand
                break
    rows = n * r
    width = d // r
    x = x.reshape(rows, width)
    t = t.reshape(rows, width)

    itemsize = max(x.dtype.itemsize, t.dtype.itemsize)

    # Widest D tile that keeps 2 inputs x 2 pipeline buffers within ~8 MiB of
    # VMEM (safe under v5e's 16 MiB scoped default, v6e/v7x 32 MiB).
    width_pad = pl.cdiv(width, 128) * 128
    budget_w = max(128, (block_bytes // (rows * itemsize)) // 128 * 128)

    if width % 128 != 0 and width_pad <= budget_w:
        # Whole row fits in a single block: use the full (unpadded) width so
        # the block exactly matches the array (no masking, no overhang).
        tile_w = width
        lane_acc = width
    else:
        tile_w = min(budget_w, width_pad)
        if tile_w >= 512:
            tile_w -= tile_w % 512
            lane_acc = 512            # lane width of the partial accumulators
        else:
            lane_acc = tile_w
    assert tile_w % lane_acc == 0
    assert tile_w % 128 == 0 or tile_w == width

    num_tiles = pl.cdiv(width, tile_w)
    full_tiles = width // tile_w      # tiles that are entirely in bounds

    # Split the reduction into independent outer chunks so the leading
    # "parallel" grid axis can be sharded across TensorCores (v7x megacore).
    n_outer = 2 if num_tiles >= 2 else 1
    n_inner = pl.cdiv(num_tiles, n_outer)
    grid_tiles = n_outer * n_inner
    last_block = num_tiles - 1

    def in_index_map(o, i):
        # Clamp so overshoot grid steps re-read the last real tile; the kernel
        # masks their contribution to zero.
        return (0, jnp.minimum(o * n_inner + i, last_block))

    kernel = functools.partial(
        _dice_kernel, n_inner=n_inner, tile_w=tile_w, lane_acc=lane_acc,
        width=width, full_tiles=full_tiles, grid_tiles=grid_tiles, rows=rows)

    num_part, den_part = pl.pallas_call(
        kernel,
        out_shape=(
            jax.ShapeDtypeStruct((n_outer, rows, lane_acc), jnp.float32),
            jax.ShapeDtypeStruct((n_outer, rows, lane_acc), jnp.float32),
        ),
        grid_spec=pltpu.PrefetchScalarGridSpec(
            num_scalar_prefetch=0,
            grid=(n_outer, n_inner),
            in_specs=[
                pl.BlockSpec((rows, tile_w), in_index_map),
                pl.BlockSpec((rows, tile_w), in_index_map),
            ],
            out_specs=[
                pl.BlockSpec((1, rows, lane_acc), lambda o, i: (o, 0, 0)),
                pl.BlockSpec((1, rows, lane_acc), lambda o, i: (o, 0, 0)),
            ],
        ),
        compiler_params=pltpu.CompilerParams(
            dimension_semantics=("parallel", "arbitrary")),
    )(x, t)

    # Tiny epilogue in plain JAX: fold outer chunks, lanes and sub-rows back
    # to per-sample sums, then apply the dice formula.
    inter = num_part.sum(axis=(0, 2)).reshape(n, r).sum(axis=1)
    denom = den_part.sum(axis=(0, 2)).reshape(n, r).sum(axis=1)
    dice = (2.0 * inter + smooth) / (denom + smooth)
    return (1.0 - jnp.sum(dice) / n).astype(jnp.float32)


def _dice_loss_ref(inputs, targets, smooth=1.0):
    n = targets.shape[0]
    x = inputs.reshape(n, -1).astype(jnp.float32)
    t = targets.reshape(n, -1).astype(jnp.float32)
    inter = jnp.sum(x * t, axis=1)
    dice = (2.0 * inter + smooth) / (jnp.sum(x, axis=1) + jnp.sum(t, axis=1) + smooth)
    return 1.0 - jnp.sum(dice) / n


if __name__ == "__main__":
    key = jax.random.PRNGKey(0)

    # Main check: NCHW inputs like the PyTorch module (sigmoid probs vs 0/1 mask).
    k1, k2 = jax.random.split(key)
    N, C, H, W = 2, 4, 16, 16
    inputs = jax.nn.sigmoid(jax.random.normal(k1, (N, C, H, W), dtype=jnp.float32))
    targets = (jax.random.uniform(k2, (N, C, H, W)) > 0.5).astype(jnp.float32)

    loss = dice_loss(inputs, targets, smooth=1.0)
    jax.block_until_ready(loss)
    ref = _dice_loss_ref(inputs, targets, smooth=1.0)
    assert jnp.allclose(loss, ref, atol=1e-5, rtol=1e-5), (loss, ref)

    # Extra check: width not a multiple of 128 (single full-width block path).
    k3, k4 = jax.random.split(k2)
    inputs2 = jax.nn.sigmoid(jax.random.normal(k3, (2, 3, 10, 10), dtype=jnp.float32))
    targets2 = (jax.random.uniform(k4, (2, 3, 10, 10)) > 0.5).astype(jnp.float32)
    loss2 = dice_loss(inputs2, targets2, smooth=1.0)
    jax.block_until_ready(loss2)
    ref2 = _dice_loss_ref(inputs2, targets2, smooth=1.0)
    assert jnp.allclose(loss2, ref2, atol=1e-5, rtol=1e-5), (loss2, ref2)

    # Extra check: force multi-tile grid with a masked trailing tile and an
    # overshoot (clamped) tile by shrinking the per-block byte budget.
    k5, k6 = jax.random.split(k4)
    inputs3 = jax.nn.sigmoid(jax.random.normal(k5, (2, 3, 33, 33), dtype=jnp.float32))
    targets3 = (jax.random.uniform(k6, (2, 3, 33, 33)) > 0.5).astype(jnp.float32)
    loss3 = dice_loss(inputs3, targets3, smooth=1.0, block_bytes=4096)
    jax.block_until_ready(loss3)
    ref3 = _dice_loss_ref(inputs3, targets3, smooth=1.0)
    assert jnp.allclose(loss3, ref3, atol=1e-5, rtol=1e-5), (loss3, ref3)

    print("KERNEL_OK")
</pallas_src>

<mosaic_0001>
module attributes {stable_mosaic.version = 11 : i64} {
  func.func @_dice_kernel(%arg0: i32, %arg1: i32, %arg2: memref<16x128xf32, #tpu.memory_space<vmem>>, %arg3: memref<16x128xf32, #tpu.memory_space<vmem>>, %arg4: memref<1x16x128xf32, #tpu.memory_space<vmem>>, %arg5: memref<1x16x128xf32, #tpu.memory_space<vmem>>) attributes {dimension_semantics = [#tpu.dimension_semantics<parallel>, #tpu.dimension_semantics<arbitrary>], iteration_bounds = array<i64: 1, 1>, scalar_prefetch = 0 : i64, scratch_operands = 0 : i64, tpu.core_type = #tpu.core_type<tc>, window_params = [{transform_indices = @transform_0, window_bounds = array<i64: 16, 128>}, {transform_indices = @transform_1, window_bounds = array<i64: 16, 128>}, {transform_indices = @transform_2, window_bounds = array<i64: 1, 16, 128>}, {transform_indices = @transform_3, window_bounds = array<i64: 1, 16, 128>}]} {
    %c0_i32 = arith.constant 0 : i32
    %0 = arith.cmpi eq, %arg1, %c0_i32 : i32
    %1 = arith.extui %0 : i1 to i32
    %c0_i32_0 = arith.constant 0 : i32
    %2 = arith.cmpi ne, %1, %c0_i32_0 : i32
    scf.if %2 {
      %cst = arith.constant 0.000000e+00 : f32
      %19 = vector.broadcast %cst : f32 to vector<1x16x128xf32>
      %c0_16 = arith.constant 0 : index
      %c0_17 = arith.constant 0 : index
      %c0_18 = arith.constant 0 : index
      %20 = vector.load %arg4[%c0_16, %c0_17, %c0_18] : memref<1x16x128xf32, #tpu.memory_space<vmem>>, vector<1x16x128xf32>
      tpu.vector_store %arg4[%c0_16, %c0_17, %c0_18], %19 {strides = array<i32>} : memref<1x16x128xf32, #tpu.memory_space<vmem>>, vector<1x16x128xf32>,
      %cst_19 = arith.constant 0.000000e+00 : f32
      %21 = vector.broadcast %cst_19 : f32 to vector<1x16x128xf32>
      %c0_20 = arith.constant 0 : index
      %c0_21 = arith.constant 0 : index
      %c0_22 = arith.constant 0 : index
      %22 = vector.load %arg5[%c0_20, %c0_21, %c0_22] : memref<1x16x128xf32, #tpu.memory_space<vmem>>, vector<1x16x128xf32>
      tpu.vector_store %arg5[%c0_20, %c0_21, %c0_22], %21 {strides = array<i32>} : memref<1x16x128xf32, #tpu.memory_space<vmem>>, vector<1x16x128xf32>,
    } else {
    }
    %c0 = arith.constant 0 : index
    %c0_1 = arith.constant 0 : index
    %c0_2 = arith.constant 0 : index
    %3 = vector.load %arg4[%c0, %c0_1, %c0_2] : memref<1x16x128xf32, #tpu.memory_space<vmem>>, vector<1x16x128xf32>
    %4 = vector.shape_cast %3 : vector<1x16x128xf32> to vector<16x128xf32>
    %c0_3 = arith.constant 0 : index
    %c0_4 = arith.constant 0 : index
    %c0_5 = arith.constant 0 : index
    %5 = vector.load %arg5[%c0_3, %c0_4, %c0_5] : memref<1x16x128xf32, #tpu.memory_space<vmem>>, vector<1x16x128xf32>
    %6 = vector.shape_cast %5 : vector<1x16x128xf32> to vector<16x128xf32>
    %c0_6 = arith.constant 0 : index
    %c0_7 = arith.constant 0 : index
    %7 = vector.load %arg2[%c0_6, %c0_7] : memref<16x128xf32, #tpu.memory_space<vmem>>, vector<16x128xf32>
    %c0_8 = arith.constant 0 : index
    %c0_9 = arith.constant 0 : index
    %8 = vector.load %arg3[%c0_8, %c0_9] : memref<16x128xf32, #tpu.memory_space<vmem>>, vector<16x128xf32>
    %9 = arith.mulf %7, %8 : vector<16x128xf32>
    %10 = arith.addf %4, %9 : vector<16x128xf32>
    %11 = arith.addf %7, %8 : vector<16x128xf32>
    %12 = arith.addf %6, %11 : vector<16x128xf32>
    %c0_10 = arith.constant 0 : index
    %c0_11 = arith.constant 0 : index
    %c0_12 = arith.constant 0 : index
    %13 = vector.load %arg4[%c0_10, %c0_11, %c0_12] : memref<1x16x128xf32, #tpu.memory_space<vmem>>, vector<1x16x128xf32>
    %14 = vector.shape_cast %13 : vector<1x16x128xf32> to vector<16x128xf32>
    %15 = vector.shape_cast %10 : vector<16x128xf32> to vector<1x16x128xf32>
    tpu.vector_store %arg4[%c0_10, %c0_11, %c0_12], %15 {strides = array<i32>} : memref<1x16x128xf32, #tpu.memory_space<vmem>>, vector<1x16x128xf32>,
    %c0_13 = arith.constant 0 : index
    %c0_14 = arith.constant 0 : index
    %c0_15 = arith.constant 0 : index
    %16 = vector.load %arg5[%c0_13, %c0_14, %c0_15] : memref<1x16x128xf32, #tpu.memory_space<vmem>>, vector<1x16x128xf32>
    %17 = vector.shape_cast %16 : vector<1x16x128xf32> to vector<16x128xf32>
    %18 = vector.shape_cast %12 : vector<16x128xf32> to vector<1x16x128xf32>
    tpu.vector_store %arg5[%c0_13, %c0_14, %c0_15], %18 {strides = array<i32>} : memref<1x16x128xf32, #tpu.memory_space<vmem>>, vector<1x16x128xf32>,
    return
  }
  func.func @transform_0(%arg0: i32, %arg1: i32) -> (i32, i32) {
    %c1_i32 = arith.constant 1 : i32
    %0 = arith.muli %arg0, %c1_i32 : i32
    %1 = arith.addi %0, %arg1 : i32
    %c0_i32 = arith.constant 0 : i32
    %2 = arith.minsi %1, %c0_i32 : i32
    %c0_i32_0 = arith.constant 0 : i32
    %c0_i32_1 = arith.constant 0 : i32
    return %c0_i32_0, %2 : i32, i32
  }
  func.func @transform_1(%arg0: i32, %arg1: i32) -> (i32, i32) {
    %c1_i32 = arith.constant 1 : i32
    %0 = arith.muli %arg0, %c1_i32 : i32
    %1 = arith.addi %0, %arg1 : i32
    %c0_i32 = arith.constant 0 : i32
    %2 = arith.minsi %1, %c0_i32 : i32
    %c0_i32_0 = arith.constant 0 : i32
    %c0_i32_1 = arith.constant 0 : i32
    return %c0_i32_0, %2 : i32, i32
  }
  func.func @transform_2(%arg0: i32, %arg1: i32) -> (i32, i32, i32) {
    %c0_i32 = arith.constant 0 : i32
    %c0_i32_0 = arith.constant 0 : i32
    %c0_i32_1 = arith.constant 0 : i32
    return %arg0, %c0_i32, %c0_i32_0 : i32, i32, i32
  }
  func.func @transform_3(%arg0: i32, %arg1: i32) -> (i32, i32, i32) {
    %c0_i32 = arith.constant 0 : i32
    %c0_i32_0 = arith.constant 0 : i32
    %c0_i32_1 = arith.constant 0 : i32
    return %arg0, %c0_i32, %c0_i32_0 : i32, i32, i32
  }
}

</mosaic_0001>

<bundles_post_ra>
// kernel: tpu_custom_call.1
= control target key start
LH: loop header
LB: loop body
LE: loop exit
PB: predicated region body
PF: predicated region fallthrough
CT: control target
= control target key end

     0   :  { %9 = vsyncpa [#allocation3], 0  ;;  %s294_s0 = inlined_call_operand.hbm [shape: f32[16,128], index: 0, kind: input, shape index: {}]   ;;  %s295_s1 = inlined_call_operand.hbm [shape: f32[16,128], index: 1, kind: input, shape index: {}]   ;;  %s296_s2 = inlined_call_operand.hbm [shape: f32[1,16,128], index: 2, kind: output, shape index: {0}]   ;;  %s297_s3 = inlined_call_operand.hbm [shape: f32[1,16,128], index: 3, kind: output, shape index: {1}]  }
   0x1   :  { %10 = vsyncpa [#allocation6], 0 }
   0x2   :  { %11 = vsyncpa [#allocation4], 0 }
   0x3   :  { %12 = vsyncpa [#allocation9], 0  ;;  %s22_s14 = sshll.u32 %s294_s0, 4  ;;  %s244_s15 = smov [#allocation2]   ;;  %s23_s14 = int_to_ptr.hbm [resolvable:$true] %s22_s14 }
   0x4   :  { %s24_s16 = sshll.u32 %s244_s15, 4  ;;  %s40_s19 = sshll.u32 %s295_s1, 4  ;;  %s25_s16 = int_to_ptr.vmem [resolvable:$true] %s24_s16  ;;  %s41_s19 = int_to_ptr.hbm [resolvable:$true] %s40_s19 }
   0x5   :  { %s245_s20 = smov 128   ;;  %s246_s21 = smov 8  }
   0x6   :  { %30 = dma.hbm_to_vmem [thread:$0]  %s23_s14, 256, %s25_s16, [#allocation3], %s245_s20, %s245_s20, %s246_s21  }
   0x7   :  { %s247_s22 = smov [#allocation5]  }
   0x8   :  { %s42_s23 = sshll.u32 %s247_s22, 4  ;;  %s43_s23 = int_to_ptr.vmem [resolvable:$true] %s42_s23 }
   0x9   :  { %48 = dma.hbm_to_vmem [thread:$0]  %s41_s19, 256, %s43_s23, [#allocation6], %s245_s20, %s245_s20, %s246_s21  }
   0xa   :  { %236 = dma.done.wait [#allocation3], 256  }
   0xb   :  { %237 = vsyncadd [#allocation3], 4294967040 }
   0xc   :  { %238 = dma.done.wait [#allocation6], 256  }
   0xd   :  { %239 = vsyncadd [#allocation6], 4294967040  ;;  %v75_v0 = vld [vmem:[#allocation2] sm:$0xff]  ;;  %v77_v1 = vld [vmem:[#allocation5] sm:$0xff]  ;;  %s248_s0 = smov [#allocation7]   ;;  %s97_s26 = sshll.u32 %s296_s2, 4  ;;  %s98_s26 = int_to_ptr.hbm [resolvable:$true] %s97_s26 }
   0xe   :  { %v76_v2 = vld [vmem:[#allocation2 + $0x8] sm:$0xff]  ;;  %v79_v3 = vmul.f32 %v77_v1, %v75_v0  ;;  %v78_v4 = vld [vmem:[#allocation5 + $0x8] sm:$0xff]  ;;  %v83_v5 = vadd.f32 %v77_v1, %v75_v0  ;;  %s95_s1 = sshll.u32 %s248_s0, 4  ;;  %s249_s27 = smov [#allocation8]   ;;  %s96_s1 = int_to_ptr.vmem [resolvable:$true] %s95_s1 }
   0xf   :  { %v80_v6 = vmul.f32 %v78_v4, %v76_v2  ;;  %v84_v7 = vadd.f32 %v78_v4, %v76_v2  ;;  %s108_s28 = sshll.u32 %s249_s27, 4  ;;  %s110_s4 = sshll.u32 %s297_s3, 4  ;;  %s109_s28 = int_to_ptr.vmem [resolvable:$true] %s108_s28  ;;  %s111_s4 = int_to_ptr.hbm [resolvable:$true] %s110_s4 }
  0x10   :  { %87 = vst [vmem:[#allocation7] sm:$0xff] %v79_v3 }
  0x11   :  { %88 = vst [vmem:[#allocation7 + $0x8] sm:$0xff] %v80_v6 }
  0x12   :  { %89 = vst [vmem:[#allocation8] sm:$0xff] %v83_v5  ;;  %103 = dma.vmem_to_hbm [thread:$0]  %s96_s1, 256, %s98_s26, [#allocation4], %s245_s20, %s245_s20, %s246_s21  }
  0x13   :  { %90 = vst [vmem:[#allocation8 + $0x8] sm:$0xff] %v84_v7 }
  0x14   :  { %116 = dma.vmem_to_hbm [thread:$0]  %s109_s28, 256, %s111_s4, [#allocation9], %s245_s20, %s245_s20, %s246_s21  }
  0x15   :  { %240 = dma.done.wait [#allocation4], 256  }
  0x16   :  { %241 = vsyncadd [#allocation4], 4294967040 }
  0x17   :  { %242 = dma.done.wait [#allocation9], 256  }
  0x18   :  { %243 = vsyncadd [#allocation9], 4294967040 }
  0x19   :  { %125 = vsyncpa [#allocation3], 1 }
  0x1a   :  { %126 = vsyncpa [#allocation6], 1 }
  0x1b   :  { %127 = vsyncpa [#allocation4], 1 }
  0x1c   :  { %128 = vsyncpa [#allocation9], 1 }

</bundles_post_ra>
